<compile_context>
chip_gen: v7x
topology: tpu7x:2x2x1
jax: 0.10.0
libtpu: 0.0.40
codegen_flags: <defaults>
</compile_context>

<pallas_src>
import functools

import jax
import jax.numpy as jnp
from jax import lax
from jax.experimental import pallas as pl
from jax.experimental.pallas import tpu as pltpu


def _round_up(a: int, m: int) -> int:
    return ((a + m - 1) // m) * m


def _cdiv(a: int, b: int) -> int:
    return (a + b - 1) // b


def _make_kernel(tb: int, tl: int, hidden: int, true_l: int, needs_l_mask: bool):
    inv_l = 1.0 / float(true_l)

    def kernel(x_ref, w_ref, b_ref, o_ref, acc_ref):
        # x_ref: (tb, tl, H)   w_ref: (H, NLp)   b_ref: (1, NLp) f32
        # o_ref: (tb, NLp) f32   acc_ref: VMEM (tb, 8, H) f32
        l = pl.program_id(1)

        @pl.when(l == 0)
        def _():
            acc_ref[...] = jnp.zeros_like(acc_ref)

        x = x_ref[...]
        if needs_l_mask:
            # Zero out-of-range sequence positions of the (possibly partial)
            # L tile using the true L.  VALU-only; no data copies.
            pos = l * tl + lax.broadcasted_iota(jnp.int32, (1, tl, hidden), 1)
            x = jnp.where(pos < true_l, x, jnp.zeros_like(x))

        # Sublane-preserving partial sum: adds corresponding sublanes of
        # different vregs (pure VALU, f32 accumulation, no wholesale upcast of
        # the bf16 block and no per-step cross-sublane XLU reduce).
        acc_ref[...] += jnp.sum(
            x.reshape(tb, tl // 8, 8, hidden), axis=1, dtype=jnp.float32)

        @pl.when(l == pl.num_programs(1) - 1)
        def _():
            # Single cross-sublane collapse per B tile; scale by 1/L in f32.
            pooled = jnp.sum(acc_ref[...], axis=1) * jnp.float32(inv_l)   # (tb, H)
            logits = jnp.dot(pooled.astype(w_ref.dtype), w_ref[...],
                             preferred_element_type=jnp.float32)
            o_ref[...] = (logits + b_ref[...]).astype(o_ref.dtype)

    return kernel


@functools.partial(jax.jit, static_argnames=("tb", "tl"))
def swin_cls_forward(sequence_output, classifier_weight, classifier_bias,
                     *, tb=None, tl=None):
    """sequence_output: (B, L, H)
       classifier_weight: (NL, H)   (PyTorch nn.Linear layout)
       classifier_bias:   (NL,)
       returns logits: (B, NL) float32
    """
    B, L, H = sequence_output.shape
    NL = classifier_weight.shape[0]
    x_dtype = sequence_output.dtype
    x_bytes = jnp.dtype(x_dtype).itemsize

    # ---- tile sizing (no padding of x anywhere) ----------------------------
    target_bytes = 6 * 1024 * 1024          # per x input buffer (double-buffered)
    if tb is None:
        # Exact B for tiny batches; otherwise a multiple of 8 sized so that at
        # least 2 B tiles exist (megacore sharding on v7x), capped at 128.
        tb = B if B <= 8 else min(128, _round_up(_cdiv(B, 2), 8))
    tb = int(tb)

    row_bytes = H * x_bytes
    if tl is None:
        tl_full = _round_up(L, 8)
        if tb * tl_full * row_bytes <= target_bytes:
            tl = tl_full                                     # whole L, one step
        else:
            tb_fit = max(8, (target_bytes // (tl_full * row_bytes)) // 8 * 8)
            if tb > tb_fit and tb_fit * tl_full * row_bytes <= target_bytes:
                tb, tl = tb_fit, tl_full                     # shrink tb, keep full L
            else:
                tl = max(8, min(tl_full,
                                (target_bytes // max(1, tb * row_bytes)) // 8 * 8))
    tl = int(tl)
    needs_l_mask = (L % tl) != 0

    NL_pad = _round_up(max(NL, 128), 128)    # lane-dense output / MXU N dim

    # ---- tiny host-side parameter prep (transpose + lane padding only) -----
    w_t = classifier_weight.T                                          # (H, NL)
    w_p = jnp.zeros((H, NL_pad), dtype=w_t.dtype).at[:, :NL].set(w_t)
    b_p = jnp.zeros((1, NL_pad), dtype=jnp.float32).at[0, :NL].set(
        classifier_bias.astype(jnp.float32))

    grid = (_cdiv(B, tb), _cdiv(L, tl))

    cost = pl.CostEstimate(
        flops=2 * B * L * H + 2 * B * H * NL_pad,
        transcendentals=0,
        bytes_accessed=(B * L * H * x_bytes
                        + H * NL_pad * jnp.dtype(w_p.dtype).itemsize
                        + NL_pad * 4 + B * NL_pad * 4),
    )

    out = pl.pallas_call(
        _make_kernel(tb, tl, H, L, needs_l_mask),
        out_shape=jax.ShapeDtypeStruct((B, NL_pad), jnp.float32),
        grid=grid,
        in_specs=[
            pl.BlockSpec((tb, tl, H), lambda b, l: (b, l, 0)),   # x streamed
            pl.BlockSpec((H, NL_pad), lambda b, l: (0, 0)),      # W resident
            pl.BlockSpec((1, NL_pad), lambda b, l: (0, 0)),      # bias resident
        ],
        out_specs=pl.BlockSpec((tb, NL_pad), lambda b, l: (b, 0)),
        scratch_shapes=[pltpu.VMEM((tb, 8, H), jnp.float32)],
        compiler_params=pltpu.CompilerParams(
            dimension_semantics=("parallel", "arbitrary"),
            vmem_limit_bytes=48 * 1024 * 1024,
        ),
        cost_estimate=cost,
    )(sequence_output, w_p, b_p)

    return out[:, :NL]


def reference_forward(sequence_output, classifier_weight, classifier_bias):
    # Pure-JAX reference mirroring the PyTorch module semantics.
    pooled = jnp.mean(sequence_output.astype(jnp.float32), axis=1)      # (B, H)
    logits = pooled @ classifier_weight.astype(jnp.float32).T
    return logits + classifier_bias.astype(jnp.float32)                 # (B, NL)


if __name__ == "__main__":
    key = jax.random.PRNGKey(0)

    def run_case(B, L, H, NL, dtype, tol):
        k = jax.random.fold_in(key, B * 100003 + L * 131 + H)
        kx, kw, kb = jax.random.split(k, 3)
        x = jax.random.normal(kx, (B, L, H), dtype=jnp.float32).astype(dtype)
        w = (jax.random.normal(kw, (NL, H), dtype=jnp.float32) * 0.02).astype(dtype)
        b = jax.random.normal(kb, (NL,), dtype=jnp.float32) * 0.02

        got = jax.block_until_ready(swin_cls_forward(x, w, b))
        ref = reference_forward(x, w, b)
        assert got.shape == (B, NL), f"bad shape {got.shape}"
        assert jnp.allclose(got, ref, atol=tol, rtol=tol), (
            f"mismatch vs reference (B={B}, L={L}, H={H}, NL={NL}, dtype={dtype})")

    # Primary small case: batch=2, seq=8, hidden=32, num_labels=10 (f32).
    run_case(2, 8, 32, 10, jnp.float32, 1e-4)
    # Unaligned tails: B not tile-aligned + Swin-like L=49 (exercises L mask path).
    run_case(3, 49, 32, 10, jnp.float32, 1e-4)
    # bf16 activations/weights (native bf16 MXU matmul path).
    run_case(2, 49, 64, 10, jnp.bfloat16, 3e-2)

    print("KERNEL_OK")
</pallas_src>

<mosaic_0001>
module attributes {stable_mosaic.version = 11 : i64} {
  func.func @kernel(%arg0: i32, %arg1: i32, %arg2: memref<2x8x32xf32, #tpu.memory_space<vmem>>, %arg3: memref<32x128xf32, #tpu.memory_space<vmem>>, %arg4: memref<1x128xf32, #tpu.memory_space<vmem>>, %arg5: memref<2x128xf32, #tpu.memory_space<vmem>>, %arg6: memref<2x8x32xf32, #tpu.memory_space<vmem>>) attributes {dimension_semantics = [#tpu.dimension_semantics<parallel>, #tpu.dimension_semantics<arbitrary>], iteration_bounds = array<i64: 1, 1>, scalar_prefetch = 0 : i64, scratch_operands = 1 : i64, tpu.core_type = #tpu.core_type<tc>, window_params = [{transform_indices = @transform_0, window_bounds = array<i64: 2, 8, 32>}, {pipeline_mode = #tpu.pipeline_mode<synchronous>, transform_indices = @transform_1, window_bounds = array<i64: 32, 128>}, {pipeline_mode = #tpu.pipeline_mode<synchronous>, transform_indices = @transform_2, window_bounds = array<i64: 1, 128>}, {transform_indices = @transform_3, window_bounds = array<i64: 2, 128>}]} {
    %c0_i32 = arith.constant 0 : i32
    %0 = arith.cmpi eq, %arg1, %c0_i32 : i32
    %1 = arith.extui %0 : i1 to i32
    %c0_i32_0 = arith.constant 0 : i32
    %2 = arith.cmpi ne, %1, %c0_i32_0 : i32
    scf.if %2 {
      %cst_11 = arith.constant 0.000000e+00 : f32
      %12 = vector.broadcast %cst_11 : f32 to vector<2x8x32xf32>
      %c0_12 = arith.constant 0 : index
      %c0_13 = arith.constant 0 : index
      %c0_14 = arith.constant 0 : index
      %13 = vector.load %arg6[%c0_12, %c0_13, %c0_14] : memref<2x8x32xf32, #tpu.memory_space<vmem>>, vector<2x8x32xf32>
      tpu.vector_store %arg6[%c0_12, %c0_13, %c0_14], %12 {strides = array<i32>} : memref<2x8x32xf32, #tpu.memory_space<vmem>>, vector<2x8x32xf32>,
    } else {
    }
    %c0 = arith.constant 0 : index
    %c0_1 = arith.constant 0 : index
    %c0_2 = arith.constant 0 : index
    %3 = vector.load %arg2[%c0, %c0_1, %c0_2] : memref<2x8x32xf32, #tpu.memory_space<vmem>>, vector<2x8x32xf32>
    %c0_3 = arith.constant 0 : index
    %c0_4 = arith.constant 0 : index
    %c0_5 = arith.constant 0 : index
    %4 = vector.load %arg6[%c0_3, %c0_4, %c0_5] : memref<2x8x32xf32, #tpu.memory_space<vmem>>, vector<2x8x32xf32>
    %5 = vector.shape_cast %3 : vector<2x8x32xf32> to vector<2x1x8x32xf32>
    %cst = arith.constant dense<0.000000e+00> : vector<2x8x32xf32>
    %6 = vector.multi_reduction <add>, %5, %cst [1] : vector<2x1x8x32xf32> to vector<2x8x32xf32>
    %7 = arith.addf %4, %6 : vector<2x8x32xf32>
    %c0_6 = arith.constant 0 : index
    %c0_7 = arith.constant 0 : index
    %c0_8 = arith.constant 0 : index
    %8 = vector.load %arg6[%c0_6, %c0_7, %c0_8] : memref<2x8x32xf32, #tpu.memory_space<vmem>>, vector<2x8x32xf32>
    tpu.vector_store %arg6[%c0_6, %c0_7, %c0_8], %7 {strides = array<i32>} : memref<2x8x32xf32, #tpu.memory_space<vmem>>, vector<2x8x32xf32>,
    %c0_i32_9 = arith.constant 0 : i32
    %9 = arith.cmpi eq, %arg1, %c0_i32_9 : i32
    %10 = arith.extui %9 : i1 to i32
    %c0_i32_10 = arith.constant 0 : i32
    %11 = arith.cmpi ne, %10, %c0_i32_10 : i32
    scf.if %11 {
      %c0_11 = arith.constant 0 : index
      %c0_12 = arith.constant 0 : index
      %c0_13 = arith.constant 0 : index
      %12 = vector.load %arg6[%c0_11, %c0_12, %c0_13] : memref<2x8x32xf32, #tpu.memory_space<vmem>>, vector<2x8x32xf32>
      %cst_14 = arith.constant dense<0.000000e+00> : vector<2x32xf32>
      %13 = vector.multi_reduction <add>, %12, %cst_14 [1] : vector<2x8x32xf32> to vector<2x32xf32>
      %cst_15 = arith.constant 1.250000e-01 : f32
      %14 = vector.broadcast %cst_15 : f32 to vector<2x32xf32>
      %15 = arith.mulf %13, %14 : vector<2x32xf32>
      %c0_16 = arith.constant 0 : index
      %c0_17 = arith.constant 0 : index
      %16 = vector.load %arg3[%c0_16, %c0_17] : memref<32x128xf32, #tpu.memory_space<vmem>>, vector<32x128xf32>
      %cst_18 = arith.constant dense<0.000000e+00> : vector<2x128xf32>
      %17 = tpu.matmul %15, %16, %cst_18 {dimension_numbers = #tpu.dot_dimension_numbers<[1], [0], [0], [1], [0, 0, 1, 1], [], []>} : vector<2x32xf32>, vector<32x128xf32>, vector<2x128xf32> -> vector<2x128xf32>
      %c0_19 = arith.constant 0 : index
      %c0_20 = arith.constant 0 : index
      %18 = vector.load %arg4[%c0_19, %c0_20] : memref<1x128xf32, #tpu.memory_space<vmem>>, vector<1x128xf32>
      %19 = vector.broadcast %18 : vector<1x128xf32> to vector<2x128xf32>
      %20 = arith.addf %17, %19 : vector<2x128xf32>
      %c0_21 = arith.constant 0 : index
      %c0_22 = arith.constant 0 : index
      %21 = vector.load %arg5[%c0_21, %c0_22] : memref<2x128xf32, #tpu.memory_space<vmem>>, vector<2x128xf32>
      tpu.vector_store %arg5[%c0_21, %c0_22], %20 {strides = array<i32>} : memref<2x128xf32, #tpu.memory_space<vmem>>, vector<2x128xf32>,
    } else {
    }
    return
  }
  func.func @transform_0(%arg0: i32, %arg1: i32) -> (i32, i32, i32) {
    %c0_i32 = arith.constant 0 : i32
    %c0_i32_0 = arith.constant 0 : i32
    return %arg0, %arg1, %c0_i32 : i32, i32, i32
  }
  func.func @transform_1(%arg0: i32, %arg1: i32) -> (i32, i32) {
    %c0_i32 = arith.constant 0 : i32
    %c0_i32_0 = arith.constant 0 : i32
    %c0_i32_1 = arith.constant 0 : i32
    return %c0_i32, %c0_i32_0 : i32, i32
  }
  func.func @transform_2(%arg0: i32, %arg1: i32) -> (i32, i32) {
    %c0_i32 = arith.constant 0 : i32
    %c0_i32_0 = arith.constant 0 : i32
    %c0_i32_1 = arith.constant 0 : i32
    return %c0_i32, %c0_i32_0 : i32, i32
  }
  func.func @transform_3(%arg0: i32, %arg1: i32) -> (i32, i32) {
    %c0_i32 = arith.constant 0 : i32
    %c0_i32_0 = arith.constant 0 : i32
    return %arg0, %c0_i32 : i32, i32
  }
}

</mosaic_0001>

<bundles_post_ra>
// kernel: swin_cls_forward.1
= control target key start
LH: loop header
LB: loop body
LE: loop exit
PB: predicated region body
PF: predicated region fallthrough
CT: control target
= control target key end

     0   :  { %vm19_vm0 = vcmask 261120   ;;  %v208_v3 = vmov 0.0|0.0   ;;  %v209_v6 = vmov 0.0   ;;  %vm210_vm1 = vmmov 0   ;;  %s272_s0 = inlined_call_operand.vmem [shape: f32[2,8,32], index: 0, kind: input, shape index: {}]   ;;  %s273_s1 = inlined_call_operand.vmem [shape: f32[32,128], index: 1, kind: input, shape index: {}]   ;;  %s274_s2 = inlined_call_operand.vmem [shape: f32[1,128], index: 2, kind: input, shape index: {}]   ;;  %s275_s3 = inlined_call_operand.hbm [shape: f32[2,128], index: 3, kind: output, shape index: {}]  }
   0x1   :  { %v54_v0 = vld [vmem:[%s273_s1] sm:$0xff]  ;;  %v55_v1 = vld [vmem:[%s273_s1 + $0x8] sm:$0xff]  ;;  %v56_v2 = vld [vmem:[%s273_s1 + $0x10] sm:$0xff]  ;;  %174 = vmatprep.subr.bf16.mxu0 %v208_v3  ;;  %20 = vst.msk [vmem:[#allocation2] sm:$0xff] %vm19_vm0, %v209_v6  ;;  %171 = vmatprep.mubr.msk.f32.mxu0 %vm210_vm1, %v209_v6 }
   0x2   :  { %v175_v4 = vpack.c.bf16 %v55_v1, %v54_v0  ;;  %v57_v5 = vld [vmem:[%s273_s1 + $0x18] sm:$0xff]  ;;  %21 = vst.msk [vmem:[#allocation2 + $0x8] sm:$0xff] %vm19_vm0, %v209_v6 }
   0x3   :  { %8 = vsyncpa [#allocation4], 0  ;;  %v178_v7 = vpack.c.bf16 %v57_v5, %v56_v2  ;;  %v22_v8 = vld [vmem:[%s272_s0] sm:$0xff]  ;;  %v23_v9 = vld [vmem:[%s272_s0 + $0x8] sm:$0xff]  ;;  %vm67_vm2 = vcmask 1041409   ;;  %s211_s24 = smov [#allocation3]  }
   0x4   :  { %176 = vmatpush3.bf16.msra.mxu0 %v175_v4  ;;  %v156_v33 = vld [vmem:[%s274_s2] ss:$0 sm:$0xff]  ;;  %s148_s25 = sshll.u32 %s211_s24, 4  ;;  %s149_s25 = int_to_ptr.vmem [resolvable:$true] %s148_s25 }
   0x5   :  { %177 = vmatprep.subr.bf16.mxu0 %v208_v3  ;;  %s184_s26 = scalar_lea.vmem %s149_s25, 32  ;;  %p189_p1 = scmp.lt.s32.totalorder %s149_s25, %s149_s25 }
   0x6   :  { %p185_p0 = scmp.ne.s32.totalorder %s149_s25, %s184_s26  ;;  %p190_p2 = scmp.lt.s32.totalorder %s184_s26, %s184_s26 }
   0x8   :  { %179 = vmatpush3.bf16.msra.mxu0 %v178_v7  ;;  %v24_v10 = vld [vmem:[#allocation2] sm:$0xff]  ;;  %p191_p3 = por %p190_p2, %p189_p1 }
   0x9   :  { %v25_v11 = vld [vmem:[#allocation2 + $0x8] sm:$0xff]  ;;  %v28_v12 = vadd.f32 %v24_v10, %v22_v8 }
   0xa   :  { %v29_v13 = vadd.f32 %v25_v11, %v23_v9  ;;  %p192_p4 = pnand %p191_p3, %p185_p0 }
   0xb   :  { %31 = vst.msk [vmem:[#allocation2] sm:$0xff] %vm19_vm0, %v28_v12 }
   0xc   :  { %32 = vst.msk [vmem:[#allocation2 + $0x8] sm:$0xff] %vm19_vm0, %v29_v13 }
  0x12   :  { %v36_v14 = vld [vmem:[#allocation2] sm:$0xff] }
  0x13   :  { %v37_v15 = vld [vmem:[#allocation2 + $0x8] sm:$0xff]  ;;  %v38_v16 = vsel %vm19_vm0, %v36_v14, 0.0 }
  0x14   :  { %v45_v17 = vsel %vm19_vm0, %v37_v15, 0.0  ;;  %v39_v18 = vrot.slane %v38_v16, 4 }
  0x15   :  { %v46_v19 = vrot.slane %v45_v17, 4 }
  0x16   :  { %v40_v20 = vadd.f32 %v39_v18, %v38_v16 }
  0x17   :  { %v47_v21 = vadd.f32 %v46_v19, %v45_v17 }
  0x18   :  { %v41_v22 = vrot.slane %v40_v20, 2 }
  0x19   :  { %v48_v23 = vrot.slane %v47_v21, 2 }
  0x1a   :  { %v42_v24 = vadd.f32 %v41_v22, %v40_v20 }
  0x1b   :  { %v49_v25 = vadd.f32 %v48_v23, %v47_v21 }
  0x1c   :  { %v43_v26 = vrot.slane %v42_v24, 1 }
  0x1d   :  { %v50_v27 = vrot.slane %v49_v25, 1 }
  0x1e   :  { %v44_v28 = vadd.f32 %v43_v26, %v42_v24 }
  0x1f   :  { %v51_v29 = vadd.f32 %v50_v27, %v49_v25 }
  0x20   :  { %v52_v30 = vmul.f32 0.125, %v44_v28 }
  0x21   :  { %v53_v31 = vmul.f32 0.125, %v51_v29 }
  0x23   :  { %v68_v32 = vsel %vm67_vm2, %v53_v31, %v52_v30 }
  0x24   :  { %172 = vmatmul.mubr.msk.f32.vlgmr.msra.gmra.mrb[0].mxu0 %vm19_vm0, %v68_v32 }
  0xf7   :  { %v137_v34 = vpop.f32.mrb[0].mxu0 }
  0xf8   :  { %v138_v35 = vadd.f32 %v156_v33, %v137_v34  ;;  %v173_v36 = vpop.f32.mrb[1].mxu0 }
  0xfa   :  { %141 = vst [vmem:[#allocation3] sm:$0x3] %v138_v35 }
  0xfb   :  { %195 = shalt.err (!%p192_p4)
}
  0xfc   :  { %s196_s29 = scalar_lea.hbm %s275_s3, 32 }
  0xfd   :  { %p197_p5 = scmp.ne.s32.totalorder %s275_s3, %s196_s29  ;;  %p200_p6 = scmp.lt.u32.totalorder %s196_s29, %s275_s3 }
  0xff   :  { %p202_p7 = pnand %p200_p6, %p197_p5 }
 0x101   :  { %205 = shalt.err (!%p202_p7)
}
 0x102   :  { %151 = dma.vmem_to_hbm [thread:$0]  %s149_s25, 32, %s275_s3, [#allocation4]  }
 0x103   :  { %206 = dma.done.wait [#allocation4], 32  }
 0x104   :  { %207 = vsyncadd [#allocation4], 4294967264 }
 0x105   :  { %155 = vsyncpa [#allocation4], 1 }

</bundles_post_ra>
